<compile_context>
chip_gen: v6e
topology: v6e:2x2x1
jax: 0.10.0
libtpu: 0.0.40
codegen_flags: <defaults>
</compile_context>

<pallas_src>
import functools

import jax
import jax.numpy as jnp
from jax.experimental import pallas as pl
from jax.experimental.pallas import tpu as pltpu

HIDDEN = 128


def _round_up(x, m):
    return (x + m - 1) // m * m


def actor_critic_kernel(state_ref, w1_ref, b1_ref, w2a_ref, w2c_ref, b2_ref,
                        out_ref, *, action_space, hidden):
    """Fused actor+critic forward on one batch tile.

    state: [TB, D]  bf16  (MXU operand)
    w1:    [D, 2H]  bf16  cols [0,H)=actor hidden, [H,2H)=critic hidden
    b1:    [1, 2H]  f32
    w2a:   [H, P]   bf16  actor head, zero-padded past `action_space` lanes
    w2c:   [1, H]   f32   critic head row (f32 VPU/XLU reduction, no MXU)
    b2:    [1, P]   f32   cols [0,A)=actor bias, col A=critic bias, rest 0
    out:   [TB, P]  f32   lane-dense slab: cols [0,A)=probs, col A=value, rest 0
    """
    # ---- fused first layer + ReLU: both hidden layers in ONE bf16 MXU matmul --
    h = jnp.dot(state_ref[...], w1_ref[...],
                preferred_element_type=jnp.float32) + b1_ref[...]
    h = jnp.maximum(h, 0.0)                                        # [TB, 2H] f32

    h_a = h[:, :hidden]          # lane-aligned (128-boundary) slices
    h_c = h[:, hidden:]

    # ---- actor head: K=128 bf16 MXU matmul into the 128-lane-padded slab -----
    logits = jnp.dot(h_a.astype(w2a_ref.dtype), w2a_ref[...],
                     preferred_element_type=jnp.float32) + b2_ref[...]   # [TB, P]

    # ---- critic head: one f32 lane-reduction (VPU/XLU slot, MXU stays free) --
    value = jnp.sum(h_c * w2c_ref[...], axis=-1, keepdims=True)         # [TB, 1]

    # ---- masked softmax over the first `action_space` lanes (stay 128-wide) --
    # NOTE: padding rows of a partial last batch tile run on undefined data and
    # may transiently hold NaN/Inf; they are discarded on writeback.
    col = jax.lax.broadcasted_iota(jnp.int32, logits.shape, dimension=1)
    is_logit = col < action_space
    masked = jnp.where(is_logit, logits, jnp.float32(-1e30))
    m = jnp.max(masked, axis=-1, keepdims=True)
    e = jnp.exp(masked - m)                                   # masked lanes -> 0
    s = jnp.sum(e, axis=-1, keepdims=True)
    probs = e / s              # exact divide: probs sum to 1 (approx recip biased it)

    # Column A: w2a's column A is all-zero, so logits[:, A] == critic bias b2c;
    # adding `value` there yields the complete critic output.  Other columns > A
    # are forced to exact zero (sliced off in the wrapper).
    out_ref[...] = jnp.where(is_logit, probs,
                             jnp.where(col == action_space, value + logits, 0.0))


def _pick_tile_b(B):
    """Batch tile size.

    - tiny B: one tile (pure launch overhead anyway).
    - B > 16: at least 2 grid steps so v7x's two TensorCores can split the
      batch via dimension_semantics=("parallel",); on single-TC v5e/v6e the
      extra ~0.35us step is negligible.
    - cap at 512 rows so double-buffered state/output tiles stay well inside
      v5e's 16 MiB / v7x's 32 MiB scoped-VMEM defaults.
    """
    if B <= 16:
        return B
    return min(512, _round_up(pl.cdiv(B, 2), 8))


def actor_critic_forward(state, packed, action_space):
    """state: [B, D] f32; packed: dict from pack_params. Returns (probs, value)."""
    B, D = state.shape
    H2 = packed["w1"].shape[1]          # 2 * HIDDEN
    H = H2 // 2
    P = packed["w2a"].shape[1]          # lane-padded output width (multiple of 128)

    TILE_B = _pick_tile_b(B)
    grid = (pl.cdiv(B, TILE_B),)

    # bf16 MXU operand; accumulation stays f32 inside the kernel.
    state_bf16 = state.astype(jnp.bfloat16)

    # VMEM footprint (pipeline double-buffers every in/out spec, including the
    # "resident" weights).  Only override the scoped-VMEM default when we would
    # actually exceed the smallest one (v5e: 16 MiB).
    bytes_tiles = TILE_B * D * 2 + TILE_B * P * 4
    bytes_weights = D * H2 * 2 + H2 * 4 + H * P * 2 + H * 4 + P * 4
    vmem_needed = 2 * (bytes_tiles + bytes_weights) + (1 << 20)
    compiler_params = pltpu.CompilerParams(
        dimension_semantics=("parallel",),          # v7x: 2 TCs split the batch
        vmem_limit_bytes=(int(vmem_needed) if vmem_needed > (16 << 20) else None),
    )

    flops = 2 * B * D * H2 + 2 * B * H * P + 2 * B * H
    bytes_accessed = (state_bf16.size * 2 + packed["w1"].size * 2
                      + packed["b1"].size * 4 + packed["w2a"].size * 2
                      + packed["w2c"].size * 4 + packed["b2"].size * 4
                      + B * P * 4)
    cost = pl.CostEstimate(flops=flops, transcendentals=B * P,
                           bytes_accessed=bytes_accessed)

    out = pl.pallas_call(
        functools.partial(actor_critic_kernel,
                          action_space=action_space, hidden=H),
        out_shape=jax.ShapeDtypeStruct((B, P), jnp.float32),
        grid=grid,
        in_specs=[
            pl.BlockSpec((TILE_B, D), lambda i: (i, 0)),    # state tile
            pl.BlockSpec((D, H2), lambda i: (0, 0)),        # fused W1 (resident)
            pl.BlockSpec((1, H2), lambda i: (0, 0)),        # fused b1
            pl.BlockSpec((H, P), lambda i: (0, 0)),         # actor head W2a
            pl.BlockSpec((1, H), lambda i: (0, 0)),         # critic head row
            pl.BlockSpec((1, P), lambda i: (0, 0)),         # fused b2 (incl. b2c)
        ],
        out_specs=pl.BlockSpec((TILE_B, P), lambda i: (i, 0)),
        compiler_params=compiler_params,
        cost_estimate=cost,
    )(state_bf16, packed["w1"], packed["b1"],
      packed["w2a"], packed["w2c"], packed["b2"])

    action_probs = out[:, :action_space]
    state_value = out[:, action_space:action_space + 1]
    return action_probs, state_value


def init_params(key, input_size, action_space, hidden=HIDDEN):
    """PyTorch-style nn.Linear init: U(-1/sqrt(fan_in), 1/sqrt(fan_in))."""
    def linear(k, fan_in, fan_out):
        kw, kb = jax.random.split(k)
        bound = 1.0 / jnp.sqrt(jnp.float32(fan_in))
        w = jax.random.uniform(kw, (fan_in, fan_out), jnp.float32, -bound, bound)
        b = jax.random.uniform(kb, (1, fan_out), jnp.float32, -bound, bound)
        return w, b

    k1, k2, k3, k4 = jax.random.split(key, 4)
    w1a, b1a = linear(k1, input_size, hidden)
    w2a, b2a = linear(k2, hidden, action_space)
    w1c, b1c = linear(k3, input_size, hidden)
    w2c, b2c = linear(k4, hidden, 1)
    return dict(w1a=w1a, b1a=b1a, w2a=w2a, b2a=b2a,
                w1c=w1c, b1c=b1c, w2c=w2c, b2c=b2c)


def pack_params(p, action_space, hidden=HIDDEN):
    """Host-side packing into the fused / lane-padded layout the kernel expects."""
    P = max(128, _round_up(action_space + 1, 128))
    # Fused first layer: actor cols [0,H), critic cols [H,2H).  bf16 MXU operand.
    w1 = jnp.concatenate([p["w1a"], p["w1c"]], axis=1).astype(jnp.bfloat16)
    b1 = jnp.concatenate([p["b1a"], p["b1c"]], axis=1).astype(jnp.float32)
    # Actor head, lane-padded with zeros past `action_space`.  bf16 MXU operand.
    w2a = jnp.zeros((hidden, P), jnp.float32)
    w2a = w2a.at[:, :action_space].set(p["w2a"]).astype(jnp.bfloat16)
    # Critic head row stays f32 (VPU/XLU reduction in-kernel).
    w2c = p["w2c"].reshape(1, hidden).astype(jnp.float32)
    # Fused bias slab: actor biases + critic bias at column `action_space`.
    b2 = jnp.zeros((1, P), jnp.float32)
    b2 = b2.at[:, :action_space].set(p["b2a"])
    b2 = b2.at[:, action_space:action_space + 1].set(p["b2c"])
    return dict(w1=w1, b1=b1, w2a=w2a, w2c=w2c, b2=b2)


def reference_forward(state, p):
    h_a = jnp.maximum(state @ p["w1a"] + p["b1a"], 0.0)
    probs = jax.nn.softmax(h_a @ p["w2a"] + p["b2a"], axis=-1)
    h_c = jnp.maximum(state @ p["w1c"] + p["b1c"], 0.0)
    value = h_c @ p["w2c"] + p["b2c"]
    return probs, value


if __name__ == "__main__":
    B, INPUT_SIZE, ACTION_SPACE = 8, 32, 4

    key = jax.random.PRNGKey(0)
    k_state, k_params = jax.random.split(key)

    state = jax.random.normal(k_state, (B, INPUT_SIZE), dtype=jnp.float32)
    params = init_params(k_params, INPUT_SIZE, ACTION_SPACE)
    packed = pack_params(params, ACTION_SPACE)

    probs, value = actor_critic_forward(state, packed, ACTION_SPACE)
    probs, value = jax.block_until_ready((probs, value))

    ref_probs, ref_value = reference_forward(state, params)
    assert probs.shape == (B, ACTION_SPACE)
    assert value.shape == (B, 1)
    # bf16 MXU operands with f32 accumulation -> small absolute error vs f32 ref.
    assert jnp.allclose(probs, ref_probs, atol=3e-2, rtol=3e-2), (
        f"probs mismatch: max abs err {jnp.max(jnp.abs(probs - ref_probs))}")
    assert jnp.allclose(value, ref_value, atol=3e-2, rtol=3e-2), (
        f"value mismatch: max abs err {jnp.max(jnp.abs(value - ref_value))}")
    # Exact divide in the softmax epilogue -> rows sum to 1 up to f32 rounding.
    assert jnp.allclose(jnp.sum(probs, axis=-1), 1.0, atol=1e-5)

    print("KERNEL_OK")
</pallas_src>

<mosaic_0001>
module attributes {stable_mosaic.version = 11 : i64} {
  func.func @actor_critic_kernel(%arg0: i32, %arg1: memref<8x32xbf16, #tpu.memory_space<vmem>>, %arg2: memref<32x256xbf16, #tpu.memory_space<vmem>>, %arg3: memref<1x256xf32, #tpu.memory_space<vmem>>, %arg4: memref<128x128xbf16, #tpu.memory_space<vmem>>, %arg5: memref<1x128xf32, #tpu.memory_space<vmem>>, %arg6: memref<1x128xf32, #tpu.memory_space<vmem>>, %arg7: memref<8x128xf32, #tpu.memory_space<vmem>>) attributes {dimension_semantics = [#tpu.dimension_semantics<parallel>], iteration_bounds = array<i64: 1>, scalar_prefetch = 0 : i64, scratch_operands = 0 : i64, tpu.core_type = #tpu.core_type<tc>, window_params = [{transform_indices = @transform_0, window_bounds = array<i64: 8, 32>}, {pipeline_mode = #tpu.pipeline_mode<synchronous>, transform_indices = @transform_1, window_bounds = array<i64: 32, 256>}, {pipeline_mode = #tpu.pipeline_mode<synchronous>, transform_indices = @transform_2, window_bounds = array<i64: 1, 256>}, {pipeline_mode = #tpu.pipeline_mode<synchronous>, transform_indices = @transform_3, window_bounds = array<i64: 128, 128>}, {pipeline_mode = #tpu.pipeline_mode<synchronous>, transform_indices = @transform_4, window_bounds = array<i64: 1, 128>}, {pipeline_mode = #tpu.pipeline_mode<synchronous>, transform_indices = @transform_5, window_bounds = array<i64: 1, 128>}, {transform_indices = @transform_6, window_bounds = array<i64: 8, 128>}]} {
    %c0 = arith.constant 0 : index
    %c0_0 = arith.constant 0 : index
    %0 = vector.load %arg1[%c0, %c0_0] : memref<8x32xbf16, #tpu.memory_space<vmem>>, vector<8x32xbf16>
    %c0_1 = arith.constant 0 : index
    %c0_2 = arith.constant 0 : index
    %1 = vector.load %arg2[%c0_1, %c0_2] : memref<32x256xbf16, #tpu.memory_space<vmem>>, vector<32x256xbf16>
    %cst = arith.constant dense<0.000000e+00> : vector<8x256xf32>
    %2 = tpu.matmul %0, %1, %cst {dimension_numbers = #tpu.dot_dimension_numbers<[1], [0], [0], [1], [0, 0, 1, 1], [], []>} : vector<8x32xbf16>, vector<32x256xbf16>, vector<8x256xf32> -> vector<8x256xf32>
    %c0_3 = arith.constant 0 : index
    %c0_4 = arith.constant 0 : index
    %3 = vector.load %arg3[%c0_3, %c0_4] : memref<1x256xf32, #tpu.memory_space<vmem>>, vector<1x256xf32>
    %4 = vector.broadcast %3 : vector<1x256xf32> to vector<8x256xf32>
    %5 = arith.addf %2, %4 : vector<8x256xf32>
    %cst_5 = arith.constant 0.000000e+00 : f32
    %6 = vector.broadcast %cst_5 : f32 to vector<8x256xf32>
    %7 = arith.maximumf %5, %6 : vector<8x256xf32>
    %8 = vector.extract_strided_slice %7 {offsets = [0, 0], sizes = [8, 128], strides = [1, 1]} : vector<8x256xf32> to vector<8x128xf32>
    %9 = vector.extract_strided_slice %7 {offsets = [0, 128], sizes = [8, 128], strides = [1, 1]} : vector<8x256xf32> to vector<8x128xf32>
    %10 = arith.truncf %8 : vector<8x128xf32> to vector<8x128xbf16>
    %c0_6 = arith.constant 0 : index
    %c0_7 = arith.constant 0 : index
    %11 = vector.load %arg4[%c0_6, %c0_7] : memref<128x128xbf16, #tpu.memory_space<vmem>>, vector<128x128xbf16>
    %cst_8 = arith.constant dense<0.000000e+00> : vector<8x128xf32>
    %12 = tpu.matmul %10, %11, %cst_8 {dimension_numbers = #tpu.dot_dimension_numbers<[1], [0], [0], [1], [0, 0, 1, 1], [], []>} : vector<8x128xbf16>, vector<128x128xbf16>, vector<8x128xf32> -> vector<8x128xf32>
    %c0_9 = arith.constant 0 : index
    %c0_10 = arith.constant 0 : index
    %13 = vector.load %arg6[%c0_9, %c0_10] : memref<1x128xf32, #tpu.memory_space<vmem>>, vector<1x128xf32>
    %14 = vector.broadcast %13 : vector<1x128xf32> to vector<8x128xf32>
    %15 = arith.addf %12, %14 : vector<8x128xf32>
    %c0_11 = arith.constant 0 : index
    %c0_12 = arith.constant 0 : index
    %16 = vector.load %arg5[%c0_11, %c0_12] : memref<1x128xf32, #tpu.memory_space<vmem>>, vector<1x128xf32>
    %17 = vector.broadcast %16 : vector<1x128xf32> to vector<8x128xf32>
    %18 = arith.mulf %9, %17 : vector<8x128xf32>
    %cst_13 = arith.constant dense<0.000000e+00> : vector<8xf32>
    %19 = vector.multi_reduction <add>, %18, %cst_13 [1] : vector<8x128xf32> to vector<8xf32>
    %20 = vector.shape_cast %19 : vector<8xf32> to vector<8x1xf32>
    %21 = tpu.iota {dimensions = array<i32: 1>} : vector<8x128xi32>
    %c4_i32 = arith.constant 4 : i32
    %22 = vector.broadcast %c4_i32 : i32 to vector<8x128xi32>
    %23 = arith.cmpi slt, %21, %22 : vector<8x128xi32>
    %cst_14 = arith.constant -1.000000e+30 : f32
    %24 = vector.broadcast %cst_14 : f32 to vector<8x128xf32>
    %25 = arith.select %23, %15, %24 : vector<8x128xi1>, vector<8x128xf32>
    %cst_15 = arith.constant dense<0xFF800000> : vector<8xf32>
    %26 = vector.multi_reduction <maximumf>, %25, %cst_15 [1] : vector<8x128xf32> to vector<8xf32>
    %27 = vector.shape_cast %26 : vector<8xf32> to vector<8x1xf32>
    %28 = vector.broadcast %27 : vector<8x1xf32> to vector<8x128xf32>
    %29 = arith.subf %25, %28 : vector<8x128xf32>
    %30 = math.exp %29 : vector<8x128xf32>
    %cst_16 = arith.constant dense<0.000000e+00> : vector<8xf32>
    %31 = vector.multi_reduction <add>, %30, %cst_16 [1] : vector<8x128xf32> to vector<8xf32>
    %32 = vector.shape_cast %31 : vector<8xf32> to vector<8x1xf32>
    %33 = vector.broadcast %32 : vector<8x1xf32> to vector<8x128xf32>
    %34 = arith.divf %30, %33 : vector<8x128xf32>
    %c4_i32_17 = arith.constant 4 : i32
    %35 = vector.broadcast %c4_i32_17 : i32 to vector<8x128xi32>
    %36 = arith.cmpi eq, %21, %35 : vector<8x128xi32>
    %37 = vector.broadcast %20 : vector<8x1xf32> to vector<8x128xf32>
    %38 = arith.addf %37, %15 : vector<8x128xf32>
    %cst_18 = arith.constant 0.000000e+00 : f32
    %39 = vector.broadcast %cst_18 : f32 to vector<8x128xf32>
    %40 = arith.select %36, %38, %39 : vector<8x128xi1>, vector<8x128xf32>
    %41 = arith.select %23, %34, %40 : vector<8x128xi1>, vector<8x128xf32>
    %c0_19 = arith.constant 0 : index
    %c0_20 = arith.constant 0 : index
    %42 = vector.load %arg7[%c0_19, %c0_20] : memref<8x128xf32, #tpu.memory_space<vmem>>, vector<8x128xf32>
    tpu.vector_store %arg7[%c0_19, %c0_20], %41 {strides = array<i32>} : memref<8x128xf32, #tpu.memory_space<vmem>>, vector<8x128xf32>,
    return
  }
  func.func @transform_0(%arg0: i32) -> (i32, i32) {
    %c0_i32 = arith.constant 0 : i32
    %c0_i32_0 = arith.constant 0 : i32
    return %arg0, %c0_i32 : i32, i32
  }
  func.func @transform_1(%arg0: i32) -> (i32, i32) {
    %c0_i32 = arith.constant 0 : i32
    %c0_i32_0 = arith.constant 0 : i32
    %c0_i32_1 = arith.constant 0 : i32
    return %c0_i32, %c0_i32_0 : i32, i32
  }
  func.func @transform_2(%arg0: i32) -> (i32, i32) {
    %c0_i32 = arith.constant 0 : i32
    %c0_i32_0 = arith.constant 0 : i32
    %c0_i32_1 = arith.constant 0 : i32
    return %c0_i32, %c0_i32_0 : i32, i32
  }
  func.func @transform_3(%arg0: i32) -> (i32, i32) {
    %c0_i32 = arith.constant 0 : i32
    %c0_i32_0 = arith.constant 0 : i32
    %c0_i32_1 = arith.constant 0 : i32
    return %c0_i32, %c0_i32_0 : i32, i32
  }
  func.func @transform_4(%arg0: i32) -> (i32, i32) {
    %c0_i32 = arith.constant 0 : i32
    %c0_i32_0 = arith.constant 0 : i32
    %c0_i32_1 = arith.constant 0 : i32
    return %c0_i32, %c0_i32_0 : i32, i32
  }
  func.func @transform_5(%arg0: i32) -> (i32, i32) {
    %c0_i32 = arith.constant 0 : i32
    %c0_i32_0 = arith.constant 0 : i32
    %c0_i32_1 = arith.constant 0 : i32
    return %c0_i32, %c0_i32_0 : i32, i32
  }
  func.func @transform_6(%arg0: i32) -> (i32, i32) {
    %c0_i32 = arith.constant 0 : i32
    %c0_i32_0 = arith.constant 0 : i32
    return %arg0, %c0_i32 : i32, i32
  }
}

</mosaic_0001>

<bundles_post_ra>
// kernel: tpu_custom_call.1
= control target key start
LH: loop header
LB: loop body
LE: loop exit
PB: predicated region body
PF: predicated region fallthrough
CT: control target
= control target key end

     0   :  { %11 = vsyncpa [#allocation3], 0  ;;  %s532_s0 = inlined_call_operand.hbm [shape: bf16[8,32], index: 0, kind: input, shape index: {}]   ;;  %s533_s1 = inlined_call_operand.hbm [shape: bf16[32,256], index: 1, kind: input, shape index: {}]   ;;  %s534_s2 = inlined_call_operand.vmem [shape: f32[1,256], index: 2, kind: input, shape index: {}]   ;;  %s535_s3 = inlined_call_operand.hbm [shape: bf16[128,128], index: 3, kind: input, shape index: {}]   ;;  %s536_s4 = inlined_call_operand.vmem [shape: f32[1,128], index: 4, kind: input, shape index: {}]   ;;  %s537_s5 = inlined_call_operand.vmem [shape: f32[1,128], index: 5, kind: input, shape index: {}]   ;;  %s538_s6 = inlined_call_operand.hbm [shape: f32[8,128], index: 6, kind: output, shape index: {}]  }
   0x1   :  { %12 = vsyncpa [#allocation6], 0 }
   0x2   :  { %13 = vsyncpa [#allocation4], 0  ;;  %s463_s21 = smov [#allocation5]  }
   0x3   :  { %s29_s22 = sshll.u32 %s463_s21, 4  ;;  %s30_s22 = int_to_ptr.vmem [resolvable:$true] %s29_s22 }
   0x4   :  { %s385_s23 = scalar_lea.vmem %s30_s22, 512  ;;  %p390_p1 = scmp.lt.s32.totalorder %s30_s22, %s30_s22 }
   0x5   :  { %p386_p0 = scmp.ne.s32.totalorder %s30_s22, %s385_s23  ;;  %p391_p2 = scmp.lt.s32.totalorder %s385_s23, %s385_s23 }
   0x7   :  { %p392_p3 = por %p391_p2, %p390_p1 }
   0x9   :  { %p393_p4 = pnand %p392_p3, %p386_p0 }
   0xb   :  { %396 = shalt.err (!%p393_p4)
}
   0xc   :  { %s464_s24 = smov 128   ;;  %s465_s25 = smov 8  }
   0xd   :  { %35 = dma.hbm_to_vmem [thread:$0]  %s533_s1, 512, %s30_s22, [#allocation6], %s464_s24, %s464_s24, %s465_s25  }
   0xe   :  { %s466_s28 = smov [#allocation2]   ;;  %s467_s30 = smov [#allocation7]  }
   0xf   :  { %s20_s29 = sshll.u32 %s466_s28, 4  ;;  %s43_s7 = sshll.u32 %s467_s30, 4  ;;  %s21_s29 = int_to_ptr.vmem [resolvable:$true] %s20_s29  ;;  %s44_s7 = int_to_ptr.vmem [resolvable:$true] %s43_s7 }
  0x10   :  { %s405_s8 = scalar_lea.vmem %s21_s29, 64  ;;  %p410_p6 = scmp.lt.s32.totalorder %s21_s29, %s21_s29 }
  0x11   :  { %p406_p5 = scmp.ne.s32.totalorder %s21_s29, %s405_s8  ;;  %p411_p7 = scmp.lt.s32.totalorder %s405_s8, %s405_s8 }
  0x13   :  { %p412_p8 = por %p411_p7, %p410_p6 }
  0x15   :  { %p413_p9 = pnand %p412_p8, %p406_p5 }
  0x17   :  { %416 = shalt.err (!%p413_p9)
}
  0x18   :  { %23 = dma.hbm_to_vmem [thread:$0]  %s532_s0, 64, %s21_s29, [#allocation3]  }
  0x19   :  { %s425_s11 = scalar_lea.vmem %s44_s7, 1024  ;;  %p430_p11 = scmp.lt.s32.totalorder %s44_s7, %s44_s7 }
  0x1a   :  { %p426_p10 = scmp.ne.s32.totalorder %s44_s7, %s425_s11  ;;  %p431_p12 = scmp.lt.s32.totalorder %s425_s11, %s425_s11 }
  0x1c   :  { %p432_p13 = por %p431_p12, %p430_p11 }
  0x1e   :  { %p433_p0 = pnand %p432_p13, %p426_p10 }
  0x20   :  { %436 = shalt.err (!%p433_p0)
}
  0x21   :  { %s468_s1 = smov 64   ;;  %s469_s12 = smov 4  }
  0x22   :  { %49 = dma.hbm_to_vmem [thread:$0]  %s535_s3, 1024, %s44_s7, [#allocation6], %s468_s1, %s468_s1, %s469_s12  }
  0x23   :  { %457 = dma.done.wait [#allocation3], 64  }
  0x24   :  { %458 = vsyncadd [#allocation3], 4294967232 }
  0x25   :  { %459 = dma.done.wait [#allocation6], 1536  }
  0x26   :  { %460 = vsyncadd [#allocation6], 4294965760  ;;  %v470_v0 = vmov 0   ;;  %v471_v1 = vmov 0.0   ;;  %v359_v2 = vld [vmem:[#allocation5 + $0x14] ss:$8 sps:$4 sm:$0xff]   ;;  %v71_v15 = vlaneseq }
  0x27   :  { %137 = vmatprep.mubr.bf16.mxu0 %v470_v0  ;;  %328 = vmatprep.subr.bf16.mxu1 %v471_v1  ;;  %v361_v3 = vld [vmem:[#allocation5 + $0x10] ss:$8 sps:$4 sm:$0xff]   ;;  %v362_v4 = vld [vmem:[#allocation5 + $0x4] ss:$8 sps:$4 sm:$0xff]   ;;  %v364_v5 = vld [vmem:[#allocation5] ss:$8 sps:$4 sm:$0xff]  }
  0x28   :  { %117 = vmatprep.subr.bf16.mxu0 %v359_v2  ;;  %v365_v6 = vld [vmem:[#allocation7 + $0x38] sm:$0xff]   ;;  %v366_v7 = vld [vmem:[#allocation7 + $0x30] sm:$0xff]   ;;  %vm101_vm0 = vcmask 261120   ;;  %v367_v9 = vld [vmem:[#allocation7 + $0x28] sm:$0xff]   ;;  %vm472_vm1 = vmmov 0   ;;  %v72_v16 = vshrl.u32 %v71_v15, 7 }
  0x29   :  { %118 = vmatpush1.bf16.msra.mxu0 %v361_v3  ;;  %329 = vmatpush3.bf16.msra.mxu1 %v365_v6  ;;  %v64_v8 = vld [vmem:[#allocation2] sm:$0xf]  ;;  %v368_v10 = vld [vmem:[#allocation7 + $0x20] sm:$0xff]   ;;  %v370_v12 = vld [vmem:[#allocation7 + $0x10] sm:$0xff]   ;;  %v271_v33 = vand.u32 127, %v71_v15 }
  0x2a   :  { %119 = vmatprep.subr.bf16.mxu0 %v362_v4  ;;  %330 = vmatprep.subr.bf16.mxu1 %v471_v1  ;;  %v369_v11 = vld [vmem:[#allocation7 + $0x18] sm:$0xff]   ;;  %v371_v13 = vld [vmem:[#allocation7 + $0x8] sm:$0xff]   ;;  %v372_v14 = vld [vmem:[#allocation7] sm:$0xff]   ;;  %v73_v17 = vsub.s32 0, %v72_v16  ;;  %v77_v19 = vsub.s32 1, %v72_v16 }
  0x2b   :  { %344 = vmatprep.mubr.msk.bf16.mxu1 %vm472_vm1, %v471_v1  ;;  %v69_v18 = vld [vmem:[%s534_s2] sm:$0x3]  ;;  %vm272_vm2 = vcmp.lt.s32.totalorder %v271_v33, 4  ;;  %vm283_vm3 = vcmp.eq.s32.totalorder %v271_v33, 4 }
  0x2c   :  { %v74_v20 = vrot.slane %v69_v18, %v73_v17  ;;  %v78_v21 = vrot.slane %v69_v18, %v77_v19  ;;  %v318_v28 = vld [vmem:[%s536_s4] ss:$0 sm:$0xff]  ;;  %s473_s4 = smov [#allocation8]  }
  0x2d   :  { %120 = vmatpush1.bf16.msra.mxu0 %v364_v5  ;;  %331 = vmatpush3.bf16.msra.mxu1 %v366_v7  ;;  %v309_v34 = vld [vmem:[%s537_s5] ss:$0 sm:$0xff]  ;;  %s294_s5 = sshll.u32 %s473_s4, 4  ;;  %s295_s5 = int_to_ptr.vmem [resolvable:$true] %s294_s5 }
  0x2e   :  { %332 = vmatprep.subr.bf16.mxu1 %v471_v1  ;;  %s437_s18 = scalar_lea.vmem %s295_s5, 128  ;;  %p442_p2 = scmp.lt.s32.totalorder %s295_s5, %s295_s5 }
  0x2f   :  { %p438_p1 = scmp.ne.s32.totalorder %s295_s5, %s437_s18  ;;  %p443_p3 = scmp.lt.s32.totalorder %s437_s18, %s437_s18 }
  0x30   :  { %308 = vmatmul.mubr.msk.bf16.vlgmr.msra.gmra.mxu0 %vm101_vm0, %v64_v8 }
  0x31   :  { %333 = vmatpush3.bf16.msra.mxu1 %v367_v9  ;;  %p444_p4 = por %p443_p3, %p442_p2 }
  0x32   :  { %334 = vmatprep.subr.bf16.mxu1 %v471_v1 }
  0x33   :  { %p445_p5 = pnand %p444_p4, %p438_p1 }
  0x35   :  { %335 = vmatpush3.bf16.msra.mxu1 %v368_v10 }
  0x36   :  { %336 = vmatprep.subr.bf16.mxu1 %v471_v1 }
  0x39   :  { %337 = vmatpush3.bf16.msra.mxu1 %v369_v11 }
  0x3a   :  { %338 = vmatprep.subr.bf16.mxu1 %v471_v1 }
  0x3d   :  { %339 = vmatpush3.bf16.msra.mxu1 %v370_v12 }
  0x3e   :  { %340 = vmatprep.subr.bf16.mxu1 %v471_v1 }
  0x41   :  { %341 = vmatpush3.bf16.msra.mxu1 %v371_v13 }
  0x42   :  { %342 = vmatprep.subr.bf16.mxu1 %v471_v1 }
  0x45   :  { %343 = vmatpush3.bf16.msra.mxu1 %v372_v14 }
  0xf0   :  { %v139_v22 = vpop.f32.mrf.mxu0 }
  0xf1   :  { %v140_v23 = vadd.f32 %v139_v22, %v74_v20 }
  0xf2   :  { %v141_v24 = vpop.f32.mrf.mxu0 }
  0xf3   :  { %v146_v25 = vmax.f32 %v140_v23, 0.0  ;;  %v142_v26 = vadd.f32 %v141_v24, %v78_v21 }
  0xf4   :  { %v143_v27 = vpop.f32.mrf.mxu0 }
  0xf5   :  { %v148_v29 = vpack.c.bf16 %v146_v25, %v146_v25  ;;  %v147_v30 = vmax.f32 %v142_v26, 0.0 }
  0xf6   :  { %v144_v31 = vpop.f32.mrf.mxu0 }
  0xf7   :  { %345 = vmatmul.mubr.bf16.vlgmr.msra.gmra.mxu1 %v148_v29  ;;  %v267_v32 = vmul.f32 %v318_v28, %v147_v30 }
  0xf9   :  { %268 = vadd.xlane.f32.xlu1 %v267_v32 }
 0x182   :  { %v269_v37 = vpop.xlane.xlu1 %268 }
 0x1b7   :  { %v254_v35 = vpop.f32.mrf.mxu1 }
 0x1b8   :  { %v255_v36 = vadd.f32 %v309_v34, %v254_v35 }
 0x1b9   :  { %v346_v38 = vpop.f32.mrf.mxu1 }
 0x1ba   :  { %v284_v39 = vadd.f32 %v269_v37, %v255_v36  ;;  %v273_v40 = vsel %vm272_vm2, %v255_v36, -1e+30 }
 0x1bb   :  { %274 = vmax.xlane.f32.xlu0 %v273_v40  ;;  %v257_v41 = vpop.f32.mrf.mxu1 }
 0x1bc   :  { %v285_v42 = vsel %vm283_vm3, %v284_v39, 0.0 }
 0x1bd   :  { %v347_v43 = vpop.f32.mrf.mxu1 }
 0x244   :  { %v275_v44 = vpop.xlane.xlu0 %274 }
 0x245   :  { %v276_v45 = vsub.f32 %v273_v40, %v275_v44 }
 0x247   :  { %v277_v46 = vmul.f32 1.442695, %v276_v45 }
 0x249   :  { %373 = vpow2.f32 %v277_v46 }
 0x256   :  { %v374_v47 = vpop.eup %373 }
 0x257   :  { %279 = vadd.xlane.f32.xlu0 %v374_v47 }
 0x2e0   :  { %v280_v48 = vpop.xlane.xlu0 %279 }
 0x2e1   :  { %375 = vrcp.f32 %v280_v48 }
 0x2ee   :  { %v376_v49 = vpop.eup %375 }
 0x2ef   :  { %v282_v50 = vmul.f32 %v376_v49, %v374_v47 }
 0x2f1   :  { %v286_v51 = vsel %vm272_vm2, %v282_v50, %v285_v42 }
 0x2f2   :  { %287 = vst [vmem:[#allocation8] sm:$0xff] %v286_v51 }
 0x2f3   :  { %448 = shalt.err (!%p445_p5)
}
 0x2f4   :  { %297 = dma.vmem_to_hbm [thread:$0]  %s295_s5, 128, %s538_s6, [#allocation4]  }
 0x2f5   :  { %461 = dma.done.wait [#allocation4], 128  }
 0x2f6   :  { %462 = vsyncadd [#allocation4], 4294967168 }
 0x2f7   :  { %301 = vsyncpa [#allocation3], 1 }
 0x2f8   :  { %302 = vsyncpa [#allocation6], 1 }
 0x2f9   :  { %303 = vsyncpa [#allocation4], 1 }

</bundles_post_ra>
